<compile_context>
chip_gen: v5e
topology: v5e:2x2
jax: 0.10.0
libtpu: 0.0.40
codegen_flags: <defaults>
</compile_context>

<pallas_src>
import jax
import jax.numpy as jnp
from jax.experimental import pallas as pl
from jax.experimental.pallas import tpu as pltpu  # noqa: F401  (kept for TPU-specific tuning hooks)

# --- "config" values (configparser in the original; chosen small & consistent) ---
N_EMBED = 32
HEAD_SIZE = 8
N_HEADS = N_EMBED // HEAD_SIZE
N_LAYERS = 2
BLOCK_SIZE = 8          # max seq length
BATCH = 2
SEQ = 8                 # T <= BLOCK_SIZE

LN_EPS = 1e-5

# Packed-parameter row layout (padded to 8 rows for a friendly sublane extent).
_P_BIAS, _P_G1, _P_B1, _P_G2, _P_B2 = 0, 1, 2, 3, 4
_P_ROWS = 8


def _layernorm(x, gamma, beta):
    # x: (M, C); gamma/beta: (1, C)
    mu = jnp.mean(x, axis=-1, keepdims=True)
    var = jnp.mean((x - mu) ** 2, axis=-1, keepdims=True)
    return (x - mu) * jax.lax.rsqrt(var + LN_EPS) * gamma + beta


def attention_block_kernel(x_ref, wt_ref, p_ref, o_ref):
    # x_ref: (M, C) with M = B*T — the entire batch flattened into one slab.
    x = x_ref[...]                          # (M, C)
    wt = wt_ref[...]                        # (C, C)  == W_proj.T
    params = p_ref[...]                     # (8, C) packed small params
    bias = params[_P_BIAS:_P_BIAS + 1, :]   # (1, C)
    g1 = params[_P_G1:_P_G1 + 1, :]
    be1 = params[_P_B1:_P_B1 + 1, :]
    g2 = params[_P_G2:_P_G2 + 1, :]
    be2 = params[_P_B2:_P_B2 + 1, :]

    # x = x + proj(ln1(x))
    h1 = _layernorm(x, g1, be1)
    x1 = x + jnp.dot(h1, wt, preferred_element_type=jnp.float32) + bias

    # x = x + proj(ln2(x))   (same proj weights — same `sa` module reused)
    h2 = _layernorm(x1, g2, be2)
    out = x1 + jnp.dot(h2, wt, preferred_element_type=jnp.float32) + bias

    o_ref[...] = out.astype(o_ref.dtype)


def attention_block(x, w_proj, b_proj, ln1_g, ln1_b, ln2_g, ln2_b):
    """x: (B, T, C) f32.  w_proj: (C, C) PyTorch-layout (out, in).  Returns (B, T, C)."""
    B, T, C = x.shape
    M = B * T

    x2d = x.reshape(M, C)                   # flatten batch into matmul M dim
    wt = w_proj.T                           # (in, out) so y = x @ wt + b

    # Pack the five small parameter vectors into one (8, C) slab (rows 5-7 pad).
    params = jnp.zeros((_P_ROWS, C), dtype=x.dtype)
    params = params.at[_P_BIAS].set(b_proj)
    params = params.at[_P_G1].set(ln1_g)
    params = params.at[_P_B1].set(ln1_b)
    params = params.at[_P_G2].set(ln2_g)
    params = params.at[_P_B2].set(ln2_b)

    out2d = pl.pallas_call(
        attention_block_kernel,
        out_shape=jax.ShapeDtypeStruct((M, C), x.dtype),
        grid_spec=pl.GridSpec(
            grid=(1,),                                      # single step: pure overhead removal
            in_specs=[
                pl.BlockSpec((M, C), lambda i: (0, 0)),     # whole flattened activation slab
                pl.BlockSpec((C, C), lambda i: (0, 0)),     # W_proj^T, resident
                pl.BlockSpec((_P_ROWS, C), lambda i: (0, 0)),  # packed small params, one DMA
            ],
            out_specs=pl.BlockSpec((M, C), lambda i: (0, 0)),
        ),
    )(x2d, wt, params)

    return out2d.reshape(B, T, C)


def attention_block_ref(x, w_proj, b_proj, ln1_g, ln1_b, ln2_g, ln2_b):
    """Pure-JAX reference of the exact PyTorch forward semantics."""
    def ln(v, g, b):
        mu = jnp.mean(v, axis=-1, keepdims=True)
        var = jnp.mean((v - mu) ** 2, axis=-1, keepdims=True)
        return (v - mu) / jnp.sqrt(var + LN_EPS) * g + b
    x = x + ln(x, ln1_g, ln1_b) @ w_proj.T + b_proj
    x = x + ln(x, ln2_g, ln2_b) @ w_proj.T + b_proj
    return x


if __name__ == "__main__":
    key = jax.random.PRNGKey(0)
    kx, kw, kb, kg1, kb1, kg2, kb2 = jax.random.split(key, 7)

    x = jax.random.normal(kx, (BATCH, SEQ, N_EMBED), dtype=jnp.float32)

    # Deterministic parameter init (synthetic; shapes match nn.Linear/LayerNorm).
    w_proj = jax.random.normal(kw, (N_EMBED, N_EMBED), dtype=jnp.float32) * 0.05
    b_proj = jax.random.normal(kb, (N_EMBED,), dtype=jnp.float32) * 0.05
    ln1_g = 1.0 + 0.1 * jax.random.normal(kg1, (N_EMBED,), dtype=jnp.float32)
    ln1_b = 0.1 * jax.random.normal(kb1, (N_EMBED,), dtype=jnp.float32)
    ln2_g = 1.0 + 0.1 * jax.random.normal(kg2, (N_EMBED,), dtype=jnp.float32)
    ln2_b = 0.1 * jax.random.normal(kb2, (N_EMBED,), dtype=jnp.float32)

    out = attention_block(x, w_proj, b_proj, ln1_g, ln1_b, ln2_g, ln2_b)
    out = jax.block_until_ready(out)

    ref = attention_block_ref(x, w_proj, b_proj, ln1_g, ln1_b, ln2_g, ln2_b)
    assert jnp.allclose(out, ref, atol=1e-5, rtol=1e-5), "mismatch vs JAX reference"

    print("KERNEL_OK")
</pallas_src>

<mosaic_0001>
module attributes {stable_mosaic.version = 11 : i64} {
  func.func @attention_block_kernel(%arg0: i32, %arg1: memref<16x32xf32, #tpu.memory_space<vmem>>, %arg2: memref<32x32xf32, #tpu.memory_space<vmem>>, %arg3: memref<8x32xf32, #tpu.memory_space<vmem>>, %arg4: memref<16x32xf32, #tpu.memory_space<vmem>>) attributes {dimension_semantics = [#tpu.dimension_semantics<arbitrary>], iteration_bounds = array<i64: 1>, scalar_prefetch = 0 : i64, scratch_operands = 0 : i64, tpu.core_type = #tpu.core_type<tc>, window_params = [{pipeline_mode = #tpu.pipeline_mode<synchronous>, transform_indices = @transform_0, window_bounds = array<i64: 16, 32>}, {pipeline_mode = #tpu.pipeline_mode<synchronous>, transform_indices = @transform_1, window_bounds = array<i64: 32, 32>}, {pipeline_mode = #tpu.pipeline_mode<synchronous>, transform_indices = @transform_2, window_bounds = array<i64: 8, 32>}, {pipeline_mode = #tpu.pipeline_mode<synchronous>, transform_indices = @transform_3, window_bounds = array<i64: 16, 32>}]} {
    %c0 = arith.constant 0 : index
    %c0_0 = arith.constant 0 : index
    %0 = vector.load %arg1[%c0, %c0_0] : memref<16x32xf32, #tpu.memory_space<vmem>>, vector<16x32xf32>
    %c0_1 = arith.constant 0 : index
    %c0_2 = arith.constant 0 : index
    %1 = vector.load %arg2[%c0_1, %c0_2] : memref<32x32xf32, #tpu.memory_space<vmem>>, vector<32x32xf32>
    %c0_3 = arith.constant 0 : index
    %c0_4 = arith.constant 0 : index
    %2 = vector.load %arg3[%c0_3, %c0_4] : memref<8x32xf32, #tpu.memory_space<vmem>>, vector<8x32xf32>
    %3 = vector.extract_strided_slice %2 {offsets = [0, 0], sizes = [1, 32], strides = [1, 1]} : vector<8x32xf32> to vector<1x32xf32>
    %4 = vector.extract_strided_slice %2 {offsets = [1, 0], sizes = [1, 32], strides = [1, 1]} : vector<8x32xf32> to vector<1x32xf32>
    %5 = vector.extract_strided_slice %2 {offsets = [2, 0], sizes = [1, 32], strides = [1, 1]} : vector<8x32xf32> to vector<1x32xf32>
    %6 = vector.extract_strided_slice %2 {offsets = [3, 0], sizes = [1, 32], strides = [1, 1]} : vector<8x32xf32> to vector<1x32xf32>
    %7 = vector.extract_strided_slice %2 {offsets = [4, 0], sizes = [1, 32], strides = [1, 1]} : vector<8x32xf32> to vector<1x32xf32>
    %cst = arith.constant dense<0.000000e+00> : vector<16xf32>
    %8 = vector.multi_reduction <add>, %0, %cst [1] : vector<16x32xf32> to vector<16xf32>
    %9 = vector.shape_cast %8 : vector<16xf32> to vector<16x1xf32>
    %cst_5 = arith.constant 3.200000e+01 : f32
    %10 = vector.broadcast %cst_5 : f32 to vector<16x1xf32>
    %11 = arith.divf %9, %10 : vector<16x1xf32>
    %12 = vector.broadcast %11 : vector<16x1xf32> to vector<16x32xf32>
    %13 = arith.subf %0, %12 : vector<16x32xf32>
    %14 = arith.mulf %13, %13 : vector<16x32xf32>
    %cst_6 = arith.constant dense<0.000000e+00> : vector<16xf32>
    %15 = vector.multi_reduction <add>, %14, %cst_6 [1] : vector<16x32xf32> to vector<16xf32>
    %16 = vector.shape_cast %15 : vector<16xf32> to vector<16x1xf32>
    %cst_7 = arith.constant 3.200000e+01 : f32
    %17 = vector.broadcast %cst_7 : f32 to vector<16x1xf32>
    %18 = arith.divf %16, %17 : vector<16x1xf32>
    %19 = vector.broadcast %11 : vector<16x1xf32> to vector<16x32xf32>
    %20 = arith.subf %0, %19 : vector<16x32xf32>
    %cst_8 = arith.constant 9.99999974E-6 : f32
    %21 = vector.broadcast %cst_8 : f32 to vector<16x1xf32>
    %22 = arith.addf %18, %21 : vector<16x1xf32>
    %23 = math.rsqrt %22 : vector<16x1xf32>
    %24 = vector.broadcast %23 : vector<16x1xf32> to vector<16x32xf32>
    %25 = arith.mulf %20, %24 : vector<16x32xf32>
    %26 = vector.broadcast %4 : vector<1x32xf32> to vector<16x32xf32>
    %27 = arith.mulf %25, %26 : vector<16x32xf32>
    %28 = vector.broadcast %5 : vector<1x32xf32> to vector<16x32xf32>
    %29 = arith.addf %27, %28 : vector<16x32xf32>
    %cst_9 = arith.constant dense<0.000000e+00> : vector<16x32xf32>
    %30 = tpu.matmul %29, %1, %cst_9 {dimension_numbers = #tpu.dot_dimension_numbers<[1], [0], [0], [1], [0, 0, 1, 1], [], []>} : vector<16x32xf32>, vector<32x32xf32>, vector<16x32xf32> -> vector<16x32xf32>
    %31 = arith.addf %0, %30 : vector<16x32xf32>
    %32 = vector.broadcast %3 : vector<1x32xf32> to vector<16x32xf32>
    %33 = arith.addf %31, %32 : vector<16x32xf32>
    %cst_10 = arith.constant dense<0.000000e+00> : vector<16xf32>
    %34 = vector.multi_reduction <add>, %33, %cst_10 [1] : vector<16x32xf32> to vector<16xf32>
    %35 = vector.shape_cast %34 : vector<16xf32> to vector<16x1xf32>
    %cst_11 = arith.constant 3.200000e+01 : f32
    %36 = vector.broadcast %cst_11 : f32 to vector<16x1xf32>
    %37 = arith.divf %35, %36 : vector<16x1xf32>
    %38 = vector.broadcast %37 : vector<16x1xf32> to vector<16x32xf32>
    %39 = arith.subf %33, %38 : vector<16x32xf32>
    %40 = arith.mulf %39, %39 : vector<16x32xf32>
    %cst_12 = arith.constant dense<0.000000e+00> : vector<16xf32>
    %41 = vector.multi_reduction <add>, %40, %cst_12 [1] : vector<16x32xf32> to vector<16xf32>
    %42 = vector.shape_cast %41 : vector<16xf32> to vector<16x1xf32>
    %cst_13 = arith.constant 3.200000e+01 : f32
    %43 = vector.broadcast %cst_13 : f32 to vector<16x1xf32>
    %44 = arith.divf %42, %43 : vector<16x1xf32>
    %45 = vector.broadcast %37 : vector<16x1xf32> to vector<16x32xf32>
    %46 = arith.subf %33, %45 : vector<16x32xf32>
    %cst_14 = arith.constant 9.99999974E-6 : f32
    %47 = vector.broadcast %cst_14 : f32 to vector<16x1xf32>
    %48 = arith.addf %44, %47 : vector<16x1xf32>
    %49 = math.rsqrt %48 : vector<16x1xf32>
    %50 = vector.broadcast %49 : vector<16x1xf32> to vector<16x32xf32>
    %51 = arith.mulf %46, %50 : vector<16x32xf32>
    %52 = vector.broadcast %6 : vector<1x32xf32> to vector<16x32xf32>
    %53 = arith.mulf %51, %52 : vector<16x32xf32>
    %54 = vector.broadcast %7 : vector<1x32xf32> to vector<16x32xf32>
    %55 = arith.addf %53, %54 : vector<16x32xf32>
    %cst_15 = arith.constant dense<0.000000e+00> : vector<16x32xf32>
    %56 = tpu.matmul %55, %1, %cst_15 {dimension_numbers = #tpu.dot_dimension_numbers<[1], [0], [0], [1], [0, 0, 1, 1], [], []>} : vector<16x32xf32>, vector<32x32xf32>, vector<16x32xf32> -> vector<16x32xf32>
    %57 = arith.addf %33, %56 : vector<16x32xf32>
    %58 = vector.broadcast %3 : vector<1x32xf32> to vector<16x32xf32>
    %59 = arith.addf %57, %58 : vector<16x32xf32>
    %c0_16 = arith.constant 0 : index
    %c0_17 = arith.constant 0 : index
    %60 = vector.load %arg4[%c0_16, %c0_17] : memref<16x32xf32, #tpu.memory_space<vmem>>, vector<16x32xf32>
    tpu.vector_store %arg4[%c0_16, %c0_17], %59 {strides = array<i32>} : memref<16x32xf32, #tpu.memory_space<vmem>>, vector<16x32xf32>,
    return
  }
  func.func @transform_0(%arg0: i32) -> (i32, i32) {
    %c0_i32 = arith.constant 0 : i32
    %c0_i32_0 = arith.constant 0 : i32
    %c0_i32_1 = arith.constant 0 : i32
    return %c0_i32, %c0_i32_0 : i32, i32
  }
  func.func @transform_1(%arg0: i32) -> (i32, i32) {
    %c0_i32 = arith.constant 0 : i32
    %c0_i32_0 = arith.constant 0 : i32
    %c0_i32_1 = arith.constant 0 : i32
    return %c0_i32, %c0_i32_0 : i32, i32
  }
  func.func @transform_2(%arg0: i32) -> (i32, i32) {
    %c0_i32 = arith.constant 0 : i32
    %c0_i32_0 = arith.constant 0 : i32
    %c0_i32_1 = arith.constant 0 : i32
    return %c0_i32, %c0_i32_0 : i32, i32
  }
  func.func @transform_3(%arg0: i32) -> (i32, i32) {
    %c0_i32 = arith.constant 0 : i32
    %c0_i32_0 = arith.constant 0 : i32
    %c0_i32_1 = arith.constant 0 : i32
    return %c0_i32, %c0_i32_0 : i32, i32
  }
}

</mosaic_0001>

<bundles_post_ra>
// kernel: tpu_custom_call.1
= control target key start
LH: loop header
LB: loop body
LE: loop exit
PB: predicated region body
PF: predicated region fallthrough
CT: control target
= control target key end

     0   :  { %8 = vsyncpa [#allocation3], 0  ;;  %s490_s0 = inlined_call_operand.hbm [shape: f32[16,32], index: 0, kind: input, shape index: {}]   ;;  %s491_s1 = inlined_call_operand.hbm [shape: f32[32,32], index: 1, kind: input, shape index: {}]   ;;  %s492_s2 = inlined_call_operand.hbm [shape: f32[8,32], index: 2, kind: input, shape index: {}]   ;;  %s493_s3 = inlined_call_operand.hbm [shape: f32[16,32], index: 3, kind: output, shape index: {}]  }
   0x1   :  { %9 = vsyncpa [#allocation6], 0 }
   0x2   :  { %10 = vsyncpa [#allocation4], 0  ;;  %s28_s14 = sshll.u32 %s491_s1, 4  ;;  %s395_s15 = smov [#allocation5]   ;;  %s29_s14 = int_to_ptr.hbm [resolvable:$true] %s28_s14 }
   0x3   :  { %s30_s16 = sshll.u32 %s395_s15, 4  ;;  %s15_s19 = sshll.u32 %s490_s0, 4  ;;  %s31_s16 = int_to_ptr.vmem [resolvable:$true] %s30_s16  ;;  %s16_s19 = int_to_ptr.hbm [resolvable:$true] %s15_s19 }
   0x4   :  { %s396_s20 = smov 128   ;;  %s397_s21 = smov 8  }
   0x5   :  { %36 = dma.hbm_to_vmem [thread:$0]  %s29_s14, 512, %s31_s16, [#allocation6], %s396_s20, %s396_s20, %s397_s21  }
   0x6   :  { %s398_s22 = smov [#allocation2]   ;;  %s42_s1 = sshll.u32 %s492_s2, 4  ;;  %s43_s1 = int_to_ptr.hbm [resolvable:$true] %s42_s1 }
   0x7   :  { %s17_s23 = sshll.u32 %s398_s22, 4  ;;  %s399_s0 = smov [#allocation7]   ;;  %s18_s23 = int_to_ptr.vmem [resolvable:$true] %s17_s23 }
   0x8   :  { %23 = dma.hbm_to_vmem [thread:$0]  %s16_s19, 256, %s18_s23, [#allocation3], %s396_s20, %s396_s20, %s397_s21  }
   0x9   :  { %s44_s26 = sshll.u32 %s399_s0, 4  ;;  %s45_s26 = int_to_ptr.vmem [resolvable:$true] %s44_s26 }
   0xa   :  { %47 = dma.hbm_to_vmem [thread:$0]  %s43_s1, 128, %s45_s26, [#allocation6]  }
   0xb   :  { %389 = dma.done.wait [#allocation3], 256  }
   0xc   :  { %390 = vsyncadd [#allocation3], 4294967040 }
   0xd   :  { %391 = dma.done.wait [#allocation6], 640  }
   0xe   :  { %392 = vsyncadd [#allocation6], 4294966656  ;;  %vm67_vm0 = vcmask 261120   ;;  %v437_v0 = vld [vmem:[#allocation2 + $0x8] sm:$0xff]  ;;  %v441_v2 = vld [vmem:[#allocation2] sm:$0xff]  ;;  %v400_v4 = vmov 32.0  }
   0xf   :  { %v71_v1 = vsel %vm67_vm0, %v437_v0, 0.0  ;;  %v68_v3 = vsel %vm67_vm0, %v441_v2, 0.0  ;;  %283 = vrcp.f32 %v400_v4  ;;  %v65_v21 = vld [vmem:[#allocation5 + $0x18] sm:$0xff]  ;;  %v64_v22 = vld [vmem:[#allocation5 + $0x10] sm:$0xff]  ;;  %v63_v23 = vld [vmem:[#allocation5 + $0x8] sm:$0xff]  ;;  %s401_s2 = smov [#allocation8]  }
  0x10   :  { %72 = vadd.xlane.f32.xlu0 %v71_v1  ;;  %268 = vmatpush.msra.mxu2 %v65_v21  ;;  %v62_v24 = vld [vmem:[#allocation5] sm:$0xff]  ;;  %s248_s27 = sshll.u32 %s401_s2, 4  ;;  %s250_s30 = sshll.u32 %s493_s3, 4  ;;  %s249_s27 = int_to_ptr.vmem [resolvable:$true] %s248_s27  ;;  %s251_s30 = int_to_ptr.hbm [resolvable:$true] %s250_s30 }
  0x11   :  { %143 = vmatpush.msra.mxu0 %v65_v21  ;;  %272 = vmatpush.msra.mxu3 %v65_v21  ;;  %v455_v36 = vld [vmem:[#allocation7] sm:$0xff] }
  0x12   :  { %227 = vmatpush.msra.mxu1 %v65_v21  ;;  %269 = vmatpush.msra.mxu2 %v64_v22  ;;  %v119_v40 = vperm.slane %v455_v36, 1  ;;  %v122_v44 = vperm.slane %v455_v36, 2  ;;  %v462_v54 = vperm.slane %v455_v36, 0 }
  0x13   :  { %144 = vmatpush.msra.mxu0 %v64_v22  ;;  %273 = vmatpush.msra.mxu3 %v64_v22 }
  0x14   :  { %228 = vmatpush.msra.mxu1 %v64_v22  ;;  %270 = vmatpush.msra.mxu2 %v63_v23 }
  0x15   :  { %v284_v5 = vpop.eup %283  ;;  %145 = vmatpush.msra.mxu0 %v63_v23  ;;  %274 = vmatpush.msra.mxu3 %v63_v23 }
  0x16   :  { %v75_v6 = vmul.f32 32.0, %v284_v5  ;;  %vm79_vm1 = vweird.f32 %v284_v5  ;;  %229 = vmatpush.msra.mxu1 %v63_v23  ;;  %271 = vmatpush.msra.mxu2 %v62_v24 }
  0x17   :  { %146 = vmatpush.msra.mxu0 %v62_v24  ;;  %275 = vmatpush.msra.mxu3 %v62_v24 }
  0x18   :  { %69 = vadd.xlane.f32.xlu0 %v68_v3  ;;  %v76_v7 = vsub.f32 1.0, %v75_v6  ;;  %230 = vmatpush.msra.mxu1 %v62_v24  ;;  %v203_v24 = vperm.slane %v455_v36, 3 }
  0x1a   :  { %v77_v8 = vmul.f32 %v284_v5, %v76_v7 }
  0x1c   :  { %v78_v9 = vadd.f32 %v284_v5, %v77_v8 }
  0x1e   :  { %v445_v10 = vsel %vm79_vm1, %v284_v5, %v78_v9 }
  0x83   :  { %v73_v11 = vpop.xlane.xlu0 %72 }
  0x84   :  { %v82_v12 = vmul.f32 %v445_v10, %v73_v11 }
  0x86   :  { %v84_v13 = vsub.f32 %v437_v0, %v82_v12 }
  0x88   :  { %v86_v14 = vmul.f32 %v84_v13, %v84_v13 }
  0x8a   :  { %v90_v15 = vsel %vm67_vm0, %v86_v14, 0.0 }
  0x8b   :  { %91 = vadd.xlane.f32.xlu1 %v90_v15  ;;  %v70_v16 = vpop.xlane.xlu0 %69 }
  0x8c   :  { %v81_v17 = vmul.f32 %v445_v10, %v70_v16 }
  0x8e   :  { %v83_v18 = vsub.f32 %v441_v2, %v81_v17 }
  0x90   :  { %v85_v19 = vmul.f32 %v83_v18, %v83_v18 }
  0x92   :  { %v87_v20 = vsel %vm67_vm0, %v85_v19, 0.0 }
  0x93   :  { %88 = vadd.xlane.f32.xlu1 %v87_v20 }
  0xfe   :  { %v92_v25 = vpop.xlane.xlu1 %91 }
  0xff   :  { %v94_v26 = vmul.f32 %v92_v25, %v445_v10 }
 0x101   :  { %v96_v27 = vadd.f32 1e-05, %v94_v26 }
 0x103   :  { %285 = vrsqrt.f32 %v96_v27  ;;  %vm113_vm3 = vweird.f32 %v96_v27 }
 0x106   :  { %v89_v28 = vpop.xlane.xlu1 %88 }
 0x107   :  { %v93_v29 = vmul.f32 %v89_v28, %v445_v10 }
 0x109   :  { %v286_v30 = vpop.eup %285  ;;  %v95_v31 = vadd.f32 1e-05, %v93_v29 }
 0x10a   :  { %v108_v32 = vmul.f32 %v286_v30, %v96_v27  ;;  %vm114_vm2 = vweird.f32 %v286_v30 }
 0x10b   :  { %287 = vrsqrt.f32 %v95_v31  ;;  %vm115_vm4 = vmor %vm113_vm3, %vm114_vm2  ;;  %vm103_vm5 = vweird.f32 %v95_v31 }
 0x10c   :  { %v109_v33 = vmul.f32 %v286_v30, %v108_v32 }
 0x10e   :  { %v110_v34 = vmul.f32 0.5, %v109_v33 }
 0x110   :  { %v111_v35 = vsub.f32 1.5, %v110_v34 }
 0x111   :  { %v288_v37 = vpop.eup %287 }
 0x112   :  { %v112_v38 = vmul.f32 %v286_v30, %v111_v35  ;;  %v98_v39 = vmul.f32 %v288_v37, %v95_v31  ;;  %vm104_vm6 = vweird.f32 %v288_v37 }
 0x113   :  { %vm105_vm7 = vmor %vm103_vm5, %vm104_vm6 }
 0x114   :  { %v116_v41 = vsel %vm115_vm4, %v286_v30, %v112_v38  ;;  %v99_v42 = vmul.f32 %v288_v37, %v98_v39 }
 0x115   :  { %v118_v43 = vmul.f32 %v116_v41, %v84_v13 }
 0x116   :  { %v100_v45 = vmul.f32 0.5, %v99_v42 }
 0x117   :  { %v121_v46 = vmul.f32 %v119_v40, %v118_v43 }
 0x118   :  { %v101_v47 = vsub.f32 1.5, %v100_v45 }
 0x119   :  { %v124_v48 = vadd.f32 %v122_v44, %v121_v46 }
 0x11a   :  { %v102_v49 = vmul.f32 %v288_v37, %v101_v47 }
 0x11b   :  { %265 = vmatmul.msk.f32.vlgmr.msra.gmra.mxu2 %vm67_vm0, %v124_v48 }
 0x11c   :  { %v106_v50 = vsel %vm105_vm7, %v288_v37, %v102_v49 }
 0x11d   :  { %v117_v51 = vmul.f32 %v106_v50, %v83_v18 }
 0x11f   :  { %v120_v52 = vmul.f32 %v119_v40, %v117_v51 }
 0x121   :  { %v123_v53 = vadd.f32 %v122_v44, %v120_v52 }
 0x123   :  { %264 = vmatmul.msk.f32.vlgmr.msra.gmra.mxu0 %vm67_vm0, %v123_v53 }
 0x19e   :  { %v151_v55 = vpop.f32.mrf.mxu2 }
 0x19f   :  { %v155_v56 = vadd.f32 %v151_v55, %v437_v0 }
 0x1a0   :  { %v148_v57 = vpop.f32.mrf.mxu0 }
 0x1a1   :  { %v158_v58 = vadd.f32 %v462_v54, %v155_v56  ;;  %v154_v59 = vadd.f32 %v148_v57, %v441_v2 }
 0x1a3   :  { %v162_v60 = vsel %vm67_vm0, %v158_v58, 0.0  ;;  %v157_v61 = vadd.f32 %v462_v54, %v154_v59 }
 0x1a4   :  { %163 = vadd.xlane.f32.xlu2 %v162_v60 }
 0x1a5   :  { %v159_v62 = vsel %vm67_vm0, %v157_v61, 0.0 }
 0x1ac   :  { %160 = vadd.xlane.f32.xlu2 %v159_v62 }
 0x217   :  { %v164_v63 = vpop.xlane.xlu2 %163 }
 0x218   :  { %v166_v1 = vmul.f32 %v164_v63, %v445_v10 }
 0x21a   :  { %v168_v3 = vsub.f32 %v158_v58, %v166_v1 }
 0x21c   :  { %v170_v4 = vmul.f32 %v168_v3, %v168_v3 }
 0x21e   :  { %v174_v0 = vsel %vm67_vm0, %v170_v4, 0.0 }
 0x21f   :  { %175 = vadd.xlane.f32.xlu0 %v174_v0  ;;  %v161_v5 = vpop.xlane.xlu2 %160 }
 0x220   :  { %v165_v6 = vmul.f32 %v161_v5, %v445_v10 }
 0x222   :  { %v167_v2 = vsub.f32 %v157_v61, %v165_v6 }
 0x224   :  { %v169_v7 = vmul.f32 %v167_v2, %v167_v2 }
 0x226   :  { %v171_v8 = vsel %vm67_vm0, %v169_v7, 0.0 }
 0x227   :  { %172 = vadd.xlane.f32.xlu1 %v171_v8 }
 0x292   :  { %v176_v9 = vpop.xlane.xlu0 %175 }
 0x293   :  { %v178_v11 = vmul.f32 %v176_v9, %v445_v10 }
 0x295   :  { %v180_v12 = vadd.f32 1e-05, %v178_v11 }
 0x297   :  { %289 = vrsqrt.f32 %v180_v12  ;;  %vm197_vm9 = vweird.f32 %v180_v12 }
 0x29a   :  { %v173_v13 = vpop.xlane.xlu1 %172 }
 0x29b   :  { %v177_v14 = vmul.f32 %v173_v13, %v445_v10  ;;  %v206_v10 = vperm.slane %v455_v36, 4 }
 0x29d   :  { %v290_v15 = vpop.eup %289  ;;  %v179_v16 = vadd.f32 1e-05, %v177_v14 }
 0x29e   :  { %v192_v17 = vmul.f32 %v290_v15, %v180_v12  ;;  %vm198_vm8 = vweird.f32 %v290_v15 }
 0x29f   :  { %291 = vrsqrt.f32 %v179_v16  ;;  %vm199_vm10 = vmor %vm197_vm9, %vm198_vm8  ;;  %vm187_vm12 = vweird.f32 %v179_v16 }
 0x2a0   :  { %v193_v18 = vmul.f32 %v290_v15, %v192_v17 }
 0x2a2   :  { %v194_v19 = vmul.f32 0.5, %v193_v18 }
 0x2a4   :  { %v195_v20 = vsub.f32 1.5, %v194_v19 }
 0x2a5   :  { %v292_v21 = vpop.eup %291 }
 0x2a6   :  { %v196_v22 = vmul.f32 %v290_v15, %v195_v20  ;;  %v182_v23 = vmul.f32 %v292_v21, %v179_v16  ;;  %vm188_vm11 = vweird.f32 %v292_v21 }
 0x2a7   :  { %vm189_vm13 = vmor %vm187_vm12, %vm188_vm11 }
 0x2a8   :  { %v200_v25 = vsel %vm199_vm10, %v290_v15, %v196_v22  ;;  %v183_v26 = vmul.f32 %v292_v21, %v182_v23 }
 0x2a9   :  { %v202_v27 = vmul.f32 %v200_v25, %v168_v3 }
 0x2aa   :  { %v184_v28 = vmul.f32 0.5, %v183_v26 }
 0x2ab   :  { %v205_v29 = vmul.f32 %v203_v24, %v202_v27 }
 0x2ac   :  { %v185_v30 = vsub.f32 1.5, %v184_v28 }
 0x2ad   :  { %v208_v31 = vadd.f32 %v206_v10, %v205_v29 }
 0x2ae   :  { %v186_v32 = vmul.f32 %v292_v21, %v185_v30 }
 0x2af   :  { %267 = vmatmul.msk.f32.vlgmr.msra.gmra.mxu3 %vm67_vm0, %v208_v31 }
 0x2b0   :  { %v190_v33 = vsel %vm189_vm13, %v292_v21, %v186_v32 }
 0x2b1   :  { %v201_v34 = vmul.f32 %v190_v33, %v167_v2 }
 0x2b3   :  { %v204_v35 = vmul.f32 %v203_v24, %v201_v34 }
 0x2b5   :  { %v207_v37 = vadd.f32 %v206_v10, %v204_v35 }
 0x2b7   :  { %266 = vmatmul.msk.f32.vlgmr.msra.gmra.mxu1 %vm67_vm0, %v207_v37 }
 0x332   :  { %v235_v38 = vpop.f32.mrf.mxu3 }
 0x333   :  { %v239_v39 = vadd.f32 %v235_v38, %v158_v58 }
 0x334   :  { %v232_v40 = vpop.f32.mrf.mxu1 }
 0x335   :  { %v241_v36 = vadd.f32 %v239_v39, %v462_v54  ;;  %v238_v41 = vadd.f32 %v232_v40, %v157_v61 }
 0x337   :  { %243 = vst.msk [vmem:[#allocation8 + $0x8] sm:$0xff] %vm67_vm0, %v241_v36  ;;  %v240_v42 = vadd.f32 %v238_v41, %v462_v54 }
 0x339   :  { %242 = vst.msk [vmem:[#allocation8] sm:$0xff] %vm67_vm0, %v240_v42 }
 0x33a   :  { %256 = dma.vmem_to_hbm [thread:$0]  %s249_s27, 256, %s251_s30, [#allocation4], %s396_s20, %s396_s20, %s397_s21  }
 0x33b   :  { %393 = dma.done.wait [#allocation4], 256  }
 0x33c   :  { %394 = vsyncadd [#allocation4], 4294967040 }
 0x33d   :  { %261 = vsyncpa [#allocation3], 1 }
 0x33e   :  { %262 = vsyncpa [#allocation6], 1 }
 0x33f   :  { %263 = vsyncpa [#allocation4], 1 }

</bundles_post_ra>
